<compile_context>
chip_gen: v5e
topology: v5e:2x2
jax: 0.10.0
libtpu: 0.0.40
codegen_flags: <defaults>
</compile_context>

<pallas_src>
import functools

import jax
import jax.numpy as jnp
from jax.experimental import pallas as pl
from jax.experimental.pallas import tpu as pltpu

LANES = 128                              # vreg lane width (fast axis)
ROW_GRANULE = 32                         # covers f32(8)/bf16(16)/fp8(32) sublane packing
TILE_BYTES_TARGET = 8 * 1024 * 1024      # ~8 MiB per block (v7x-friendly)
VMEM_LIMIT_BYTES = 48 * 1024 * 1024      # 2 bufs x (in+out) x 8 MiB = 32 MiB + headroom
MIN_PIPELINE_BYTES = 1 * 1024 * 1024     # above this, force a multi-block grid
MIN_PIPELINE_BLOCKS = 4                  # >=4 blocks so read/write DMAs overlap


def _threshold_accumulate_saturate_kernel(x_ref, o_ref, *, v_th0, v_l):
    """Fused elementwise: out = max(x + v_th0, v_l).

    x_ref, o_ref: (tile_rows, 128) VMEM tiles. v_th0 / v_l are Python-float
    closure constants -> VPU immediates (one vadd + one vmax per vreg).
    """
    o_ref[...] = jnp.maximum(x_ref[...] + v_th0, v_l)


def threshold_accumulate_with_saturate(v_th_adpt: jax.Array,
                                       v_th0: float,
                                       v_l: float,
                                       *,
                                       donate_input: bool = False) -> jax.Array:
    """JAX/Pallas equivalent of ThresholdAccumulateWithSaturate.forward.

    Set donate_input=True only when the caller donates v_th_adpt at the jit
    boundary; otherwise XLA would insert a defensive copy.
    """
    orig_shape = v_th_adpt.shape
    dtype = v_th_adpt.dtype
    if not jnp.issubdtype(dtype, jnp.floating):
        raise TypeError(
            "threshold_accumulate_with_saturate expects a floating dtype, "
            f"got {dtype}")

    v_th0 = float(v_th0)
    v_l = float(v_l)

    flat = v_th_adpt.reshape(-1)          # pure metadata
    n = flat.shape[0]
    n_main = (n // LANES) * LANES

    # Degenerate case: fewer than one lane row -> two trivial VPU ops in jnp.
    if n_main == 0:
        return jnp.maximum(flat + v_th0, v_l).reshape(orig_shape)

    if n_main == n:
        x2d = flat.reshape(-1, LANES)      # common case: zero-copy reshape
    else:
        x2d = flat[:n_main].reshape(-1, LANES)
    rows = x2d.shape[0]

    # Block sizing: cap at ~8 MiB, row count a multiple of 32 (sublane packing);
    # for anything bigger than ~1 MiB force >= 4 blocks so the pipeline has
    # steps to overlap (single block => serial read then write).
    itemsize = jnp.dtype(dtype).itemsize
    target_rows = max(
        ROW_GRANULE,
        (TILE_BYTES_TARGET // (LANES * itemsize)) // ROW_GRANULE * ROW_GRANULE)
    total_bytes = rows * LANES * itemsize
    if total_bytes <= MIN_PIPELINE_BYTES:
        tile_rows = rows                   # tiny: single full-extent block (always legal)
    else:
        quarter_rows = (rows // MIN_PIPELINE_BLOCKS) // ROW_GRANULE * ROW_GRANULE
        tile_rows = max(ROW_GRANULE, min(target_rows, quarter_rows))
    grid = (pl.cdiv(rows, tile_rows),)     # ragged last block handled by Pallas

    kernel = functools.partial(
        _threshold_accumulate_saturate_kernel, v_th0=v_th0, v_l=v_l)

    out2d = pl.pallas_call(
        kernel,
        out_shape=jax.ShapeDtypeStruct((rows, LANES), dtype),
        grid_spec=pltpu.PrefetchScalarGridSpec(
            num_scalar_prefetch=0,
            grid=grid,
            in_specs=[pl.BlockSpec((tile_rows, LANES), lambda i: (i, 0))],
            out_specs=pl.BlockSpec((tile_rows, LANES), lambda i: (i, 0)),
        ),
        compiler_params=pltpu.CompilerParams(
            dimension_semantics=("parallel",),   # megacore-shardable
            vmem_limit_bytes=VMEM_LIMIT_BYTES,
        ),
        input_output_aliases=({0: 0} if donate_input else {}),
    )(x2d)

    if n_main != n:
        # <128-element tail computed in plain JAX (no full-tensor pad/slice pass).
        tail = jnp.maximum(flat[n_main:] + v_th0, v_l)
        out = jnp.concatenate([out2d.reshape(-1), tail]).reshape(orig_shape)
    else:
        out = out2d.reshape(orig_shape)
    return out


if __name__ == "__main__":
    key = jax.random.PRNGKey(0)
    v_th0 = 0.5    # base threshold
    v_l = 0.2      # lower saturation bound

    def _ref(x):
        return jnp.maximum(x + v_th0, v_l)

    # Primary small example consistent with an SNN membrane-threshold map (NCHW).
    N, C, H, W = 2, 4, 16, 16
    v_th_adpt = jax.random.normal(key, (N, C, H, W), dtype=jnp.float32)
    out = threshold_accumulate_with_saturate(v_th_adpt, v_th0, v_l)
    out = jax.block_until_ready(out)
    assert out.shape == v_th_adpt.shape and out.dtype == v_th_adpt.dtype
    assert jnp.allclose(out, _ref(v_th_adpt), atol=1e-6), "mismatch (small NCHW)"

    # Exercise the multi-block pipelined path (>1 MiB, ragged last block).
    k1, k2 = jax.random.split(key)
    x_med = jax.random.normal(k1, (4, 16, 64, 66), dtype=jnp.float32)
    out_med = jax.block_until_ready(
        threshold_accumulate_with_saturate(x_med, v_th0, v_l))
    assert jnp.allclose(out_med, _ref(x_med), atol=1e-6), "mismatch (pipelined)"

    # Exercise the non-128-aligned tail path (prefix kernel + jnp tail).
    x_odd = jax.random.normal(k2, (2, 3, 100), dtype=jnp.float32)
    out_odd = jax.block_until_ready(
        threshold_accumulate_with_saturate(x_odd, v_th0, v_l))
    assert out_odd.shape == x_odd.shape
    assert jnp.allclose(out_odd, _ref(x_odd), atol=1e-6), "mismatch (odd tail)"

    print("KERNEL_OK")
</pallas_src>

<mosaic_0001>
module attributes {stable_mosaic.version = 11 : i64} {
  func.func @_threshold_accumulate_saturate_kernel(%arg0: i32, %arg1: memref<16x128xf32, #tpu.memory_space<vmem>>, %arg2: memref<16x128xf32, #tpu.memory_space<vmem>>) attributes {dimension_semantics = [#tpu.dimension_semantics<parallel>], iteration_bounds = array<i64: 1>, scalar_prefetch = 0 : i64, scratch_operands = 0 : i64, tpu.core_type = #tpu.core_type<tc>, window_params = [{transform_indices = @transform_0, window_bounds = array<i64: 16, 128>}, {transform_indices = @transform_1, window_bounds = array<i64: 16, 128>}]} {
    %c0 = arith.constant 0 : index
    %c0_0 = arith.constant 0 : index
    %0 = vector.load %arg1[%c0, %c0_0] : memref<16x128xf32, #tpu.memory_space<vmem>>, vector<16x128xf32>
    %cst = arith.constant 5.000000e-01 : f32
    %1 = vector.broadcast %cst : f32 to vector<16x128xf32>
    %2 = arith.addf %0, %1 : vector<16x128xf32>
    %cst_1 = arith.constant 2.000000e-01 : f32
    %3 = vector.broadcast %cst_1 : f32 to vector<16x128xf32>
    %4 = arith.maximumf %2, %3 : vector<16x128xf32>
    %c0_2 = arith.constant 0 : index
    %c0_3 = arith.constant 0 : index
    %5 = vector.load %arg2[%c0_2, %c0_3] : memref<16x128xf32, #tpu.memory_space<vmem>>, vector<16x128xf32>
    tpu.vector_store %arg2[%c0_2, %c0_3], %4 {strides = array<i32>} : memref<16x128xf32, #tpu.memory_space<vmem>>, vector<16x128xf32>,
    return
  }
  func.func @transform_0(%arg0: i32) -> (i32, i32) {
    %c0_i32 = arith.constant 0 : i32
    %c0_i32_0 = arith.constant 0 : i32
    return %arg0, %c0_i32 : i32, i32
  }
  func.func @transform_1(%arg0: i32) -> (i32, i32) {
    %c0_i32 = arith.constant 0 : i32
    %c0_i32_0 = arith.constant 0 : i32
    return %arg0, %c0_i32 : i32, i32
  }
}

</mosaic_0001>

<bundles_post_ra>
// kernel: tpu_custom_call.1
= control target key start
LH: loop header
LB: loop body
LE: loop exit
PB: predicated region body
PF: predicated region fallthrough
CT: control target
= control target key end

     0   :  { %6 = vsyncpa [#allocation3], 0  ;;  %s128_s0 = inlined_call_operand.hbm [shape: f32[16,128], index: 0, kind: input, shape index: {}]   ;;  %s129_s1 = inlined_call_operand.hbm [shape: f32[16,128], index: 1, kind: output, shape index: {}]  }
   0x1   :  { %7 = vsyncpa [#allocation4], 0  ;;  %s12_s8 = sshll.u32 %s128_s0, 4  ;;  %s108_s9 = smov [#allocation2]   ;;  %s13_s8 = int_to_ptr.hbm [resolvable:$true] %s12_s8 }
   0x2   :  { %s14_s10 = sshll.u32 %s108_s9, 4  ;;  %s109_s11 = smov 128   ;;  %s15_s10 = int_to_ptr.vmem [resolvable:$true] %s14_s10 }
   0x3   :  { %s110_s12 = smov 8  }
   0x4   :  { %20 = dma.hbm_to_vmem [thread:$0]  %s13_s8, 256, %s15_s10, [#allocation3], %s109_s11, %s109_s11, %s110_s12  }
   0x5   :  { %104 = dma.done.wait [#allocation3], 256  }
   0x6   :  { %105 = vsyncadd [#allocation3], 4294967040  ;;  %v25_v0 = vld [vmem:[#allocation2] sm:$0xff]  ;;  %v26_v1 = vld [vmem:[#allocation2 + $0x8] sm:$0xff]  ;;  %s111_s13 = smov [#allocation5]   ;;  %s39_s17 = sshll.u32 %s129_s1, 4  ;;  %s40_s17 = int_to_ptr.hbm [resolvable:$true] %s39_s17 }
   0x7   :  { %v27_v2 = vadd.f32 0.5, %v25_v0  ;;  %v28_v3 = vadd.f32 0.5, %v26_v1  ;;  %s37_s14 = sshll.u32 %s111_s13, 4  ;;  %s38_s14 = int_to_ptr.vmem [resolvable:$true] %s37_s14 }
   0x9   :  { %v29_v4 = vmax.f32 %v27_v2, 0.2  ;;  %v30_v5 = vmax.f32 %v28_v3, 0.2 }
   0xb   :  { %31 = vst [vmem:[#allocation5] sm:$0xff] %v29_v4 }
   0xc   :  { %32 = vst [vmem:[#allocation5 + $0x8] sm:$0xff] %v30_v5 }
   0xd   :  { %45 = dma.vmem_to_hbm [thread:$0]  %s38_s14, 256, %s40_s17, [#allocation4], %s109_s11, %s109_s11, %s110_s12  }
   0xe   :  { %106 = dma.done.wait [#allocation4], 256  }
   0xf   :  { %107 = vsyncadd [#allocation4], 4294967040 }
  0x10   :  { %50 = vsyncpa [#allocation3], 1 }
  0x11   :  { %51 = vsyncpa [#allocation4], 1 }

</bundles_post_ra>
